<compile_context>
chip_gen: v7x
topology: tpu7x:2x2x1
jax: 0.10.0
libtpu: 0.0.40
codegen_flags: <defaults>
</compile_context>

<pallas_src>
import functools

import jax
import jax.numpy as jnp
from jax import lax
from jax.experimental import pallas as pl
from jax.experimental.pallas import tpu as pltpu


def _round_up(x, m):
    return (x + m - 1) // m * m


def _loss_de_kernel(dp_ref, dt_ref, fp_ref, ft_ref, ld_ref, lf_ref, *,
                    dx, eps_t, eps_b, tb, tiles_per_core, batch, n_grid):
    """Fused LossDE kernel.

    Grid = (num_cores, tiles_per_core).  Each core owns one resident (1,128) accumulator
    block for the distri (trapezoid-KL) sum and one (1,128) block holding the frac
    (binary-KL) sum (written once at t == 0).
    """
    c = pl.program_id(0)
    t = pl.program_id(1)

    @pl.when(t == 0)
    def _init():
        # Zero this core's distri accumulator.
        ld_ref[...] = jnp.zeros_like(ld_ref)
        # Fused binary KL over the fraction vector (tiny; rides under the first tile's
        # DMA).  Every core writes its own copy; the wrapper reads core 0 / lane 0.
        fp = fp_ref[...].astype(jnp.float32)
        ft = ft_ref[...].astype(jnp.float32)
        kld_b = (ft * (jnp.log(ft + eps_b) - jnp.log(fp + eps_b))
                 + (1.0 - ft) * (jnp.log(1.0 - ft + eps_b) - jnp.log(1.0 - fp + eps_b)))
        lf_ref[...] = jnp.full(lf_ref.shape, jnp.sum(kld_b), dtype=lf_ref.dtype)

    # Upcast per tile (inputs may be bf16) -- cast rides in free VPU slots under the DMA.
    dp = dp_ref[...].astype(jnp.float32)                           # (tb, N)
    dt = dt_ref[...].astype(jnp.float32)                           # (tb, N)

    # In-kernel tail-row masking (replaces the old jnp.pad HBM round trip).  Must mask to
    # safe values BEFORE the logs: out-of-bounds block rows are garbage.
    row = ((c * tiles_per_core + t) * tb
           + lax.broadcasted_iota(jnp.int32, (tb, n_grid), 0))
    valid = row < batch
    dt = jnp.where(valid, dt, 0.0)
    dp = jnp.where(valid, dp, 1.0)

    # log of ratio as a log difference: two EUP pushes, no f32 divide chain.
    integrand = dt * (jnp.log(dt + eps_t) - jnp.log(dp + eps_t))   # (tb, N)

    # trapz(f, dx) = sum(f * w) with w = dx*[0.5, 1, ..., 1, 0.5]; N is whole per block
    # so columns 0 and N-1 are the true global endpoints.
    col = lax.broadcasted_iota(jnp.int32, (1, n_grid), 1)
    w = jnp.where((col == 0) | (col == n_grid - 1), 0.5 * dx, dx)
    partial = jnp.sum(integrand * w)                               # scalar, this tile

    ld_ref[...] += partial                                         # resident accumulator


def loss_de(y_pred, y_true, dx, eps_trapz=1e-10, eps_binary=1e-6,
            reduction='mean', tile_batch=None, num_cores=2):
    """Pallas implementation of LossDE.forward. Returns (total, l_distri, l_frac)."""
    if reduction not in ('mean', 'sum'):
        # TODO(synk): other reduce_loss modes (e.g. 'square') not wired in.
        raise NotImplementedError(f"reduction={reduction!r} not supported")

    distri_pred, frac_pred = y_pred
    distri_true, frac_true = y_true

    distri_pred = jnp.asarray(distri_pred)          # keep input dtype (bf16 ok)
    distri_true = jnp.asarray(distri_true)
    B, N = distri_pred.shape

    # Lane-dense layout for the fraction vectors (keep input dtype).
    frac_pred = jnp.asarray(frac_pred).reshape(1, -1)
    frac_true = jnp.asarray(frac_true).reshape(1, -1)
    n_frac = frac_pred.shape[1]

    psz = distri_pred.dtype.itemsize
    tsz = distri_true.dtype.itemsize

    # ---- batch tile size: keep double-buffered distri inputs under ~20 MiB ----
    g = 16  # sublane granularity safe for both f32 (8) and packed bf16 (16) layouts
    if tile_batch is None:
        budget = 20 * 1024 * 1024
        bytes_per_row = N * (psz + tsz)
        tb = max(g, min(2048, (budget // (2 * bytes_per_row)) // g * g))
    else:
        tb = max(g, _round_up(int(tile_batch), g))
    tb = min(tb, _round_up(B, g))
    num_tiles = -(-B // tb)

    nc = max(1, min(int(num_cores), num_tiles))     # 2-way TC split (v7x); free elsewhere
    tpc = -(-num_tiles // nc)                       # tiles per core (last may be a dummy)

    # Dummy grid points (when num_tiles % nc != 0) clamp to the last real tile; their
    # rows are all >= B so the in-kernel mask zeroes their contribution.
    def distri_idx(c, t):
        return (jnp.minimum(c * tpc + t, num_tiles - 1), 0)

    kernel = functools.partial(
        _loss_de_kernel, dx=float(dx), eps_t=float(eps_trapz), eps_b=float(eps_binary),
        tb=tb, tiles_per_core=tpc, batch=B, n_grid=N)

    in_block_bytes = tb * N * (psz + tsz)
    vmem_limit = int(min(32 << 20, max(24 << 20, 2 * in_block_bytes + 10 * tb * N * 4)))

    cost = pl.CostEstimate(
        flops=int(6 * B * N + 10 * n_frac),
        transcendentals=int(2 * B * N + 4 * n_frac),
        bytes_accessed=int(B * N * (psz + tsz) + n_frac * (frac_pred.dtype.itemsize
                                                           + frac_true.dtype.itemsize)
                           + 2 * nc * 128 * 4))

    ld_out, lf_out = pl.pallas_call(
        kernel,
        grid=(nc, tpc),
        in_specs=[
            pl.BlockSpec((tb, N), distri_idx),
            pl.BlockSpec((tb, N), distri_idx),
            pl.BlockSpec((1, n_frac), lambda c, t: (0, 0)),   # resident across the grid
            pl.BlockSpec((1, n_frac), lambda c, t: (0, 0)),
        ],
        out_specs=[
            pl.BlockSpec((1, 128), lambda c, t: (0, c)),      # per-core accumulator
            pl.BlockSpec((1, 128), lambda c, t: (0, c)),      # per-core frac sum
        ],
        out_shape=[
            jax.ShapeDtypeStruct((1, nc * 128), jnp.float32),
            jax.ShapeDtypeStruct((1, nc * 128), jnp.float32),
        ],
        compiler_params=pltpu.CompilerParams(
            dimension_semantics=("parallel", "arbitrary"),
            vmem_limit_bytes=vmem_limit),
        cost_estimate=cost,
    )(distri_pred, distri_true, frac_pred, frac_true)

    l_distri_sum = jnp.sum(ld_out.reshape(nc, 128)[:, 0])
    l_frac_sum = lf_out[0, 0]

    if reduction == 'mean':
        l_distri = l_distri_sum / B
        l_frac = l_frac_sum / n_frac
    else:  # 'sum'
        l_distri = l_distri_sum
        l_frac = l_frac_sum
    return l_distri + l_frac, l_distri, l_frac


def _loss_de_ref(y_pred, y_true, dx, eps_trapz=1e-10, eps_binary=1e-6):
    """Pure-JAX reference mirroring the PyTorch code (f32)."""
    dp, fp = y_pred
    dt, ft = y_true
    integrand = dt * jnp.log((dt + eps_trapz) / (dp + eps_trapz))
    trap = dx * (jnp.sum(integrand, axis=-1)
                 - 0.5 * (integrand[:, 0] + integrand[:, -1]))
    l_distri = jnp.mean(trap)
    kld_b = (ft * jnp.log((ft + eps_binary) / (fp + eps_binary))
             + (1.0 - ft) * jnp.log((1.0 - ft + eps_binary) / (1.0 - fp + eps_binary)))
    l_frac = jnp.mean(kld_b)
    return l_distri + l_frac, l_distri, l_frac


def _check(got, ref, rtol, atol, tag):
    for g, r, name in zip(got, ref, ("total", "l_distri", "l_frac")):
        assert jnp.allclose(g, r, rtol=rtol, atol=atol), (tag, name, g, r)


if __name__ == "__main__":
    key = jax.random.PRNGKey(0)
    k1, k2, k3, k4, k5, k6, k7, k8 = jax.random.split(key, 8)

    # ---------------- f32 test: B=20, N=128 ----------------
    B, N, dx = 20, 128, 0.05
    dp = jax.random.uniform(k1, (B, N), jnp.float32, 0.01, 1.0)
    dt = jax.random.uniform(k2, (B, N), jnp.float32, 0.01, 1.0)
    dp = dp / (jnp.sum(dp, axis=-1, keepdims=True) * dx)
    dt = dt / (jnp.sum(dt, axis=-1, keepdims=True) * dx)
    fp = jax.random.uniform(k3, (B,), jnp.float32, 0.05, 0.95)
    ft = jax.random.uniform(k4, (B,), jnp.float32, 0.05, 0.95)

    ref = _loss_de_ref((dp, fp), (dt, ft), dx=dx)

    # Multi-tile, 2-core path (2 tiles of 16 rows, ragged last tile masked in-kernel).
    out = loss_de((dp, fp), (dt, ft), dx=dx, tile_batch=16)
    jax.block_until_ready(out[0])
    _check(out, ref, rtol=1e-4, atol=1e-6, tag="f32 tiled")

    # Default tile-size path (single tile, single core).
    out2 = loss_de((dp, fp), (dt, ft), dx=dx)
    jax.block_until_ready(out2[0])
    _check(out2, ref, rtol=1e-4, atol=1e-6, tag="f32 default")

    # -------- bf16 test: B=40, N=256 (odd tile count -> dummy grid point) --------
    B2, N2, dx2 = 40, 256, 0.02
    dp2 = jax.random.uniform(k5, (B2, N2), jnp.float32, 0.01, 1.0)
    dt2 = jax.random.uniform(k6, (B2, N2), jnp.float32, 0.01, 1.0)
    dp2 = dp2 / (jnp.sum(dp2, axis=-1, keepdims=True) * dx2)
    dt2 = dt2 / (jnp.sum(dt2, axis=-1, keepdims=True) * dx2)
    fp2 = jax.random.uniform(k7, (B2,), jnp.float32, 0.05, 0.95)
    ft2 = jax.random.uniform(k8, (B2,), jnp.float32, 0.05, 0.95)

    dp2b, dt2b = dp2.astype(jnp.bfloat16), dt2.astype(jnp.bfloat16)
    fp2b, ft2b = fp2.astype(jnp.bfloat16), ft2.astype(jnp.bfloat16)

    ref2 = _loss_de_ref((dp2b.astype(jnp.float32), fp2b.astype(jnp.float32)),
                        (dt2b.astype(jnp.float32), ft2b.astype(jnp.float32)), dx=dx2)
    out3 = loss_de((dp2b, fp2b), (dt2b, ft2b), dx=dx2, tile_batch=16)  # 3 tiles, 2 cores
    jax.block_until_ready(out3[0])
    _check(out3, ref2, rtol=1e-4, atol=1e-5, tag="bf16 tiled")

    print("KERNEL_OK")
</pallas_src>

<mosaic_0001>
module attributes {stable_mosaic.version = 11 : i64} {
  func.func @_loss_de_kernel(%arg0: i32, %arg1: i32, %arg2: memref<16x128xf32, #tpu.memory_space<vmem>>, %arg3: memref<16x128xf32, #tpu.memory_space<vmem>>, %arg4: memref<1x20xf32, #tpu.memory_space<vmem>>, %arg5: memref<1x20xf32, #tpu.memory_space<vmem>>, %arg6: memref<1x128xf32, #tpu.memory_space<vmem>>, %arg7: memref<1x128xf32, #tpu.memory_space<vmem>>) attributes {dimension_semantics = [#tpu.dimension_semantics<parallel>, #tpu.dimension_semantics<arbitrary>], iteration_bounds = array<i64: 2, 1>, scalar_prefetch = 0 : i64, scratch_operands = 0 : i64, tpu.core_type = #tpu.core_type<tc>, window_params = [{transform_indices = @transform_0, window_bounds = array<i64: 16, 128>}, {transform_indices = @transform_1, window_bounds = array<i64: 16, 128>}, {pipeline_mode = #tpu.pipeline_mode<synchronous>, transform_indices = @transform_2, window_bounds = array<i64: 1, 20>}, {pipeline_mode = #tpu.pipeline_mode<synchronous>, transform_indices = @transform_3, window_bounds = array<i64: 1, 20>}, {transform_indices = @transform_4, window_bounds = array<i64: 1, 128>}, {transform_indices = @transform_5, window_bounds = array<i64: 1, 128>}]} {
    %c0_i32 = arith.constant 0 : i32
    %0 = arith.cmpi eq, %arg1, %c0_i32 : i32
    %1 = arith.extui %0 : i1 to i32
    %c0_i32_0 = arith.constant 0 : i32
    %2 = arith.cmpi ne, %1, %c0_i32_0 : i32
    scf.if %2 {
      %cst_15 = arith.constant 0.000000e+00 : f32
      %44 = vector.broadcast %cst_15 : f32 to vector<1x128xf32>
      %c0_16 = arith.constant 0 : index
      %c0_17 = arith.constant 0 : index
      %45 = vector.load %arg6[%c0_16, %c0_17] : memref<1x128xf32, #tpu.memory_space<vmem>>, vector<1x128xf32>
      tpu.vector_store %arg6[%c0_16, %c0_17], %44 {strides = array<i32>} : memref<1x128xf32, #tpu.memory_space<vmem>>, vector<1x128xf32>,
      %c0_18 = arith.constant 0 : index
      %c0_19 = arith.constant 0 : index
      %46 = vector.load %arg4[%c0_18, %c0_19] : memref<1x20xf32, #tpu.memory_space<vmem>>, vector<1x20xf32>
      %c0_20 = arith.constant 0 : index
      %c0_21 = arith.constant 0 : index
      %47 = vector.load %arg5[%c0_20, %c0_21] : memref<1x20xf32, #tpu.memory_space<vmem>>, vector<1x20xf32>
      %cst_22 = arith.constant 9.99999997E-7 : f32
      %48 = vector.broadcast %cst_22 : f32 to vector<1x20xf32>
      %49 = arith.addf %47, %48 : vector<1x20xf32>
      %50 = math.log %49 : vector<1x20xf32>
      %cst_23 = arith.constant 9.99999997E-7 : f32
      %51 = vector.broadcast %cst_23 : f32 to vector<1x20xf32>
      %52 = arith.addf %46, %51 : vector<1x20xf32>
      %53 = math.log %52 : vector<1x20xf32>
      %54 = arith.subf %50, %53 : vector<1x20xf32>
      %55 = arith.mulf %47, %54 : vector<1x20xf32>
      %cst_24 = arith.constant 1.000000e+00 : f32
      %56 = vector.broadcast %cst_24 : f32 to vector<1x20xf32>
      %57 = arith.subf %56, %47 : vector<1x20xf32>
      %cst_25 = arith.constant 1.000000e+00 : f32
      %58 = vector.broadcast %cst_25 : f32 to vector<1x20xf32>
      %59 = arith.subf %58, %47 : vector<1x20xf32>
      %cst_26 = arith.constant 9.99999997E-7 : f32
      %60 = vector.broadcast %cst_26 : f32 to vector<1x20xf32>
      %61 = arith.addf %59, %60 : vector<1x20xf32>
      %62 = math.log %61 : vector<1x20xf32>
      %cst_27 = arith.constant 1.000000e+00 : f32
      %63 = vector.broadcast %cst_27 : f32 to vector<1x20xf32>
      %64 = arith.subf %63, %46 : vector<1x20xf32>
      %cst_28 = arith.constant 9.99999997E-7 : f32
      %65 = vector.broadcast %cst_28 : f32 to vector<1x20xf32>
      %66 = arith.addf %64, %65 : vector<1x20xf32>
      %67 = math.log %66 : vector<1x20xf32>
      %68 = arith.subf %62, %67 : vector<1x20xf32>
      %69 = arith.mulf %57, %68 : vector<1x20xf32>
      %70 = arith.addf %55, %69 : vector<1x20xf32>
      %71 = vector.shape_cast %70 : vector<1x20xf32> to vector<1x1x20xf32>
      %cst_29 = arith.constant dense<0.000000e+00> : vector<1xf32>
      %72 = vector.multi_reduction <add>, %71, %cst_29 [1, 2] : vector<1x1x20xf32> to vector<1xf32>
      %73 = vector.shape_cast %72 : vector<1xf32> to vector<1x1x1xf32>
      %74 = vector.extract %73[0, 0, 0] : f32 from vector<1x1x1xf32>
      %75 = vector.broadcast %74 : f32 to vector<1x128xf32>
      %c0_30 = arith.constant 0 : index
      %c0_31 = arith.constant 0 : index
      %76 = vector.load %arg7[%c0_30, %c0_31] : memref<1x128xf32, #tpu.memory_space<vmem>>, vector<1x128xf32>
      tpu.vector_store %arg7[%c0_30, %c0_31], %75 {strides = array<i32>} : memref<1x128xf32, #tpu.memory_space<vmem>>, vector<1x128xf32>,
    } else {
    }
    %c0 = arith.constant 0 : index
    %c0_1 = arith.constant 0 : index
    %3 = vector.load %arg2[%c0, %c0_1] : memref<16x128xf32, #tpu.memory_space<vmem>>, vector<16x128xf32>
    %c0_2 = arith.constant 0 : index
    %c0_3 = arith.constant 0 : index
    %4 = vector.load %arg3[%c0_2, %c0_3] : memref<16x128xf32, #tpu.memory_space<vmem>>, vector<16x128xf32>
    %c1_i32 = arith.constant 1 : i32
    %5 = arith.muli %arg0, %c1_i32 : i32
    %6 = arith.addi %5, %arg1 : i32
    %c16_i32 = arith.constant 16 : i32
    %7 = arith.muli %6, %c16_i32 : i32
    %8 = tpu.iota {dimensions = array<i32: 0>} : vector<16x128xi32>
    %9 = vector.broadcast %7 : i32 to vector<16x128xi32>
    %10 = arith.addi %9, %8 : vector<16x128xi32>
    %c20_i32 = arith.constant 20 : i32
    %11 = vector.broadcast %c20_i32 : i32 to vector<16x128xi32>
    %12 = arith.cmpi slt, %10, %11 : vector<16x128xi32>
    %cst = arith.constant 0.000000e+00 : f32
    %13 = vector.broadcast %cst : f32 to vector<16x128xf32>
    %14 = arith.select %12, %4, %13 : vector<16x128xi1>, vector<16x128xf32>
    %cst_4 = arith.constant 1.000000e+00 : f32
    %15 = vector.broadcast %cst_4 : f32 to vector<16x128xf32>
    %16 = arith.select %12, %3, %15 : vector<16x128xi1>, vector<16x128xf32>
    %cst_5 = arith.constant 1.000000e-10 : f32
    %17 = vector.broadcast %cst_5 : f32 to vector<16x128xf32>
    %18 = arith.addf %14, %17 : vector<16x128xf32>
    %19 = math.log %18 : vector<16x128xf32>
    %cst_6 = arith.constant 1.000000e-10 : f32
    %20 = vector.broadcast %cst_6 : f32 to vector<16x128xf32>
    %21 = arith.addf %16, %20 : vector<16x128xf32>
    %22 = math.log %21 : vector<16x128xf32>
    %23 = arith.subf %19, %22 : vector<16x128xf32>
    %24 = arith.mulf %14, %23 : vector<16x128xf32>
    %25 = tpu.iota {dimensions = array<i32: 1>} : vector<1x128xi32>
    %c0_i32_7 = arith.constant 0 : i32
    %26 = vector.broadcast %c0_i32_7 : i32 to vector<1x128xi32>
    %27 = arith.cmpi eq, %25, %26 : vector<1x128xi32>
    %c127_i32 = arith.constant 127 : i32
    %28 = vector.broadcast %c127_i32 : i32 to vector<1x128xi32>
    %29 = arith.cmpi eq, %25, %28 : vector<1x128xi32>
    %30 = arith.ori %27, %29 : vector<1x128xi1>
    %cst_8 = arith.constant 2.500000e-02 : f32
    %cst_9 = arith.constant 5.000000e-02 : f32
    %31 = vector.broadcast %cst_8 : f32 to vector<1x128xf32>
    %32 = vector.broadcast %cst_9 : f32 to vector<1x128xf32>
    %33 = arith.select %30, %31, %32 : vector<1x128xi1>, vector<1x128xf32>
    %34 = vector.broadcast %33 : vector<1x128xf32> to vector<16x128xf32>
    %35 = arith.mulf %24, %34 : vector<16x128xf32>
    %36 = vector.shape_cast %35 : vector<16x128xf32> to vector<1x16x128xf32>
    %cst_10 = arith.constant dense<0.000000e+00> : vector<1xf32>
    %37 = vector.multi_reduction <add>, %36, %cst_10 [1, 2] : vector<1x16x128xf32> to vector<1xf32>
    %38 = vector.shape_cast %37 : vector<1xf32> to vector<1x1x1xf32>
    %39 = vector.extract %38[0, 0, 0] : f32 from vector<1x1x1xf32>
    %c0_11 = arith.constant 0 : index
    %c0_12 = arith.constant 0 : index
    %40 = vector.load %arg6[%c0_11, %c0_12] : memref<1x128xf32, #tpu.memory_space<vmem>>, vector<1x128xf32>
    %41 = vector.broadcast %39 : f32 to vector<1x128xf32>
    %42 = arith.addf %40, %41 : vector<1x128xf32>
    %c0_13 = arith.constant 0 : index
    %c0_14 = arith.constant 0 : index
    %43 = vector.load %arg6[%c0_13, %c0_14] : memref<1x128xf32, #tpu.memory_space<vmem>>, vector<1x128xf32>
    tpu.vector_store %arg6[%c0_13, %c0_14], %42 {strides = array<i32>} : memref<1x128xf32, #tpu.memory_space<vmem>>, vector<1x128xf32>,
    return
  }
  func.func @transform_0(%arg0: i32, %arg1: i32) -> (i32, i32) {
    %c1_i32 = arith.constant 1 : i32
    %0 = arith.muli %arg0, %c1_i32 : i32
    %1 = arith.addi %0, %arg1 : i32
    %c1_i32_0 = arith.constant 1 : i32
    %2 = arith.minsi %1, %c1_i32_0 : i32
    %c0_i32 = arith.constant 0 : i32
    %c0_i32_1 = arith.constant 0 : i32
    return %2, %c0_i32 : i32, i32
  }
  func.func @transform_1(%arg0: i32, %arg1: i32) -> (i32, i32) {
    %c1_i32 = arith.constant 1 : i32
    %0 = arith.muli %arg0, %c1_i32 : i32
    %1 = arith.addi %0, %arg1 : i32
    %c1_i32_0 = arith.constant 1 : i32
    %2 = arith.minsi %1, %c1_i32_0 : i32
    %c0_i32 = arith.constant 0 : i32
    %c0_i32_1 = arith.constant 0 : i32
    return %2, %c0_i32 : i32, i32
  }
  func.func @transform_2(%arg0: i32, %arg1: i32) -> (i32, i32) {
    %c0_i32 = arith.constant 0 : i32
    %c0_i32_0 = arith.constant 0 : i32
    %c0_i32_1 = arith.constant 0 : i32
    return %c0_i32, %c0_i32_0 : i32, i32
  }
  func.func @transform_3(%arg0: i32, %arg1: i32) -> (i32, i32) {
    %c0_i32 = arith.constant 0 : i32
    %c0_i32_0 = arith.constant 0 : i32
    %c0_i32_1 = arith.constant 0 : i32
    return %c0_i32, %c0_i32_0 : i32, i32
  }
  func.func @transform_4(%arg0: i32, %arg1: i32) -> (i32, i32) {
    %c0_i32 = arith.constant 0 : i32
    %c0_i32_0 = arith.constant 0 : i32
    return %c0_i32, %arg0 : i32, i32
  }
  func.func @transform_5(%arg0: i32, %arg1: i32) -> (i32, i32) {
    %c0_i32 = arith.constant 0 : i32
    %c0_i32_0 = arith.constant 0 : i32
    return %c0_i32, %arg0 : i32, i32
  }
}

</mosaic_0001>

<bundles_post_ra>
// kernel: tpu_custom_call.1
= control target key start
LH: loop header
LB: loop body
LE: loop exit
PB: predicated region body
PF: predicated region fallthrough
CT: control target
= control target key end

     0   :  { %11 = vsyncpa [#allocation3], 0  ;;  %s1286_s0 = inlined_call_operand.hbm [shape: f32[20,128], index: 0, kind: input, shape index: {}]   ;;  %s1287_s1 = inlined_call_operand.hbm [shape: f32[20,128], index: 1, kind: input, shape index: {}]   ;;  %s1288_s2 = inlined_call_operand.vmem [shape: f32[1,20], index: 2, kind: input, shape index: {}]   ;;  %s1289_s3 = inlined_call_operand.vmem [shape: f32[1,20], index: 3, kind: input, shape index: {}]   ;;  %s1290_s4 = inlined_call_operand.hbm [shape: f32[1,256], index: 4, kind: output, shape index: {0}]   ;;  %s1291_s5 = inlined_call_operand.hbm [shape: f32[1,256], index: 5, kind: output, shape index: {1}]  }
   0x1   :  { %13 = vsyncpa [#allocation3 + $0x1], 0 }
   0x2   :  { %14 = vsyncpa [#allocation6], 0 }
   0x3   :  { %16 = vsyncpa [#allocation6 + $0x1], 0 }
   0x4   :  { %17 = vsyncpa [#allocation4], 0 }
   0x5   :  { %19 = vsyncpa [#allocation4 + $0x1], 0 }
   0x6   :  { %20 = vsyncpa [#allocation9], 0 }
   0x7   :  { %22 = vsyncpa [#allocation9 + $0x1], 0  ;;  %s980_s18 = smov 0   ;;  %s982_s19 = smov 0  }
   0x8   :  { %s984_s20 = smov 0   ;;  %s986_s21 = smov 0  }
   0x9   :  { %s988_s22 = smov 0   ;;  %s990_s23 = smov 0  }
   0xa   :  { %s992_s24 = smov 0   ;;  %s994_s25 = smov 0  }
   0xb   :  { %s996_s26 = smov 0  }
   0xc LB: > { %1296 = sst [smem:[#allocation14_spill]] %s934_s25  ;;  %s600_s27 = sadd.s32 4294967295, %s938_s26   ;;  %s938_s26 = sphi %s996_s26, %s28_s26   ;;  %s934_s25 = sphi %s994_s25, %s1310_s25   ;;  %s930_s24 = sphi %s992_s24, %s1309_s24   ;;  %s926_s23 = sphi %s990_s23, %s1316_s23   ;;  %s922_s22 = sphi %s988_s22, %s1315_s22   ;;  %s918_s21 = sphi %s986_s21, %s1314_s21   ;;  %s914_s20 = sphi %s984_s20, %s1313_s20   ;;  %s910_s19 = sphi %s982_s19, %s1312_s19   ;;  %s906_s18 = sphi %s980_s18, %s1311_s18  }
   0xd   : > { %s601_s28 = sadd.s32 4294967294, %s938_s26   ;;  %s40_s29 = sadd.s32 1, %s934_s25 }
   0xe   : > { %p45_p0 = scmp.lt.s32.totalorder %s934_s25, 1  ;;  %p42_p1 = scmp.ge.s32.totalorder %s40_s29, 2 }
   0xf   : > { %s53_s30 = sadd.s32 1, %s926_s23  ;;  %p60_p2 = scmp.ne.s32.totalorder %s926_s23, %s922_s22 }
  0x10   : > { %s1029_s6 = scalar_select %p45_p0, %s934_s25, 1 }
  0x11   : > { %s1318_s29 = smov (%p42_p1, %s40_s29), 0  ;;  %p61_p3 = scmp.eq.s32.totalorder %s938_s26, 0 }
  0x12   : > { %1297 = sst [smem:[#allocation15_spill]] %s1318_s29  ;;  %p48_p4 = scmp.lt.s32.totalorder %s1318_s29, 1 }
  0x13   : > { %p66_p5 = scmp.ne.s32.totalorder %s922_s22, %s918_s21  ;;  %p1038_p6 = por %p61_p3, %p60_p2 }
  0x14   : > { %p67_p7 = scmp.eq.s32.totalorder %s600_s27, 0  ;;  %s150_s10 = ssub.s32 %s934_s25, %s1318_s29 }
  0x15   : > { %s49_s8 = scalar_select %p48_p4, %s1318_s29, 1 }
  0x16   : > { %p1043_p8 = por %p67_p7, %p66_p5  ;;  %p151_p9 = scmp.eq.s32.totalorder %s150_s10, 0 }
  0x17   : > { %s50_s11 = ssub.s32 %s1029_s6, %s49_s8  ;;  %s153_s12 = sadd.s32 1, %s914_s20 }
  0x18   : > { %p51_p10 = scmp.eq.s32.totalorder %s50_s11, 0  ;;  %p163_p11 = scmp.ne.s32.totalorder %s914_s20, %s910_s19 }
  0x19   : > { %s1052_s13 = scalar_select %p151_p9, %s914_s20, %s153_s12  }
  0x1a   : > { %s1055_s14 = scalar_select %p51_p10, %s926_s23, %s53_s30  }
  0x1b   : > { %1300 = sst [smem:[#allocation16_spill]] %s1052_s13  ;;  %p164_p12 = scmp.eq.s32.totalorder %s600_s27, 1 }
  0x1c   : > { %1301 = sst [smem:[#allocation17_spill]] %s1055_s14  ;;  %p169_p13 = scmp.ne.s32.totalorder %s910_s19, %s906_s18 }
  0x1d   : > { %p170_p0 = scmp.eq.s32.totalorder %s601_s28, 1  ;;  %p1061_p1 = por %p164_p12, %p163_p11 }
  0x1e   : > { %p1294_p3 = scmp.ge.s32.totalorder %s938_s26, 2 }
  0x1f   : > { %s1302_s15 = scalar_select %p1061_p1, 1, 0 }
  0x20   : > { %p1065_p2 = por %p170_p0, %p169_p13  ;;  %218 = sbr.rel (%p1294_p3) target bundleno = 109 (0x6d), region = 24 }
  0x22   : > { %s1303_s16 = scalar_select %p1065_p2, 1, 0 }
  0x27   : > { %221 = sbr.rel (!%p1038_p6) target bundleno = 74 (0x4a), region = 28  ;;  %s222_s17 = sand.u32 (%p1038_p6), 1, %s926_s23  }
  0x28   : > { %s605_s21 = sshll.u32 (%p1038_p6), %s1029_s6, 1  ;;  %s604_s27 = sshll.u32 (%p1038_p6), %s222_s17, 4 }
  0x29   : > { %s231_s28 = ssub.s32 (%p1038_p6), 3, %s605_s21  ;;  %s1079_s10 = scalar_lea.sflag (%p1038_p6), [#allocation3], %s222_s17 }
  0x2a   : > { %p232_p4 = scmp.lt.s32.totalorder (%p1038_p6), %s231_s28, 2  ;;  %s226_s11 = scalar_lea.vmem (%p1038_p6), [#allocation2], %s604_s27 }
  0x2e   : > { %s1320_s28 = smov (!%p232_p4, %s231_s28), 2 }
  0x2f   : > { %s1076_s30 = sshll.u32 %s1320_s28, 7 }
  0x30   : > { %s236_s8 = ssub.s32 256, %s1076_s30 }
  0x31   : > { %237 = vsyncadd %s1079_s10, %s236_s8  ;;  %p607_p5 = scmp.ne.s32.totalorder %s1076_s30, 0  ;;  %s626_s12 = sshll.u32 %s1029_s6, 8 }
  0x32   : > { %s1087_s21 = scalar_lea.hbm %s1286_s0, %s626_s12  ;;  %s242_s17 = sshll.u32 %s226_s11, 4  ;;  %s1089_s17 = int_to_ptr.vmem [resolvable:$true] %s242_s17 }
  0x33   : > { %s740_s27 = scalar_lea.hbm %s1087_s21, %s1076_s30  ;;  %s744_s14 = scalar_lea.hbm %s1286_s0, 384 }
  0x34   : > { %p741_p7 = scmp.ne.s32.totalorder %s1087_s21, %s740_s27  ;;  %p745_p11 = scmp.lt.u32.totalorder %s1087_s21, %s1286_s0 }
  0x35   : > { %p746_p12 = scmp.lt.u32.totalorder %s744_s14, %s740_s27  ;;  %p748_p0 = scmp.lt.u32.totalorder %s740_s27, %s1087_s21 }
  0x36   : > { %p742_p9 = pnand %p741_p7, %p607_p5 }
  0x37   : > { %p747_p13 = por %p746_p12, %p745_p11 }
  0x38   : > { %p743_p10 = pneg %p742_p9 }
  0x39   : > { %p749_p4 = por %p748_p0, %p747_p13 }
  0x3b   : > { %p750_p3 = pnand %p749_p4, %p743_p10 }
  0x3d   : > { %753 = shalt.err (!%p750_p3)
}
  0x3e   : > { %s754_s29 = scalar_lea.vmem %s1089_s17, %s1076_s30  ;;  %s940_s11 = smov [#allocation2]  }
  0x3f   : > { %p755_p7 = scmp.ne.s32.totalorder %s1089_s17, %s754_s29  ;;  %s758_s12 = sshll.u32 %s940_s11, 4  ;;  %s759_s12 = int_to_ptr.vmem [resolvable:$false] %s758_s12 }
  0x40   : > { %s760_s13 = scalar_lea.vmem %s759_s12, 512  ;;  %p761_p1 = scmp.lt.s32.totalorder %s1089_s17, %s759_s12 }
  0x41   : > { %p756_p9 = pnand %p755_p7, %p607_p5  ;;  %p762_p11 = scmp.lt.s32.totalorder %s760_s13, %s754_s29 }
  0x43   : > { %p757_p2 = pneg %p756_p9  ;;  %p763_p12 = por %p762_p11, %p761_p1 }
  0x45   : > { %p764_p13 = pnand %p763_p12, %p757_p2 }
  0x47   : > { %767 = shalt.err (!%p764_p13)
}
  0x48   : > { %s941_s14 = smov 128   ;;  %s942_s27 = smov 8  }
  0x49   : > { %248 = dma.hbm_to_vmem [thread:$0]  (%p607_p5), %s1087_s21, %s1076_s30, %s1089_s17, %s1079_s10, %s941_s14, %s941_s14, %s942_s27  }
  0x4a PF: > { %251 = sbr.rel (!%p1038_p6) target bundleno = 109 (0x6d), region = 32  ;;  %s252_s28 = sand.u32 (%p1038_p6), 1, %s926_s23  }
  0x4b   : > { %s612_s8 = sshll.u32 (%p1038_p6), %s1029_s6, 1  ;;  %s611_s25 = sshll.u32 (%p1038_p6), %s252_s28, 4 }
  0x4c   : > { %s261_s29 = ssub.s32 (%p1038_p6), 3, %s612_s8  ;;  %s1123_s13 = scalar_lea.sflag (%p1038_p6), [#allocation6], %s252_s28 }
  0x4d   : > { %p262_p1 = scmp.lt.s32.totalorder (%p1038_p6), %s261_s29, 2  ;;  %s256_s30 = scalar_lea.vmem (%p1038_p6), [#allocation5], %s611_s25 }
  0x51   : > { %s1322_s29 = smov (!%p262_p1, %s261_s29), 2 }
  0x52   : > { %s1120_s11 = sshll.u32 %s1322_s29, 7 }
  0x53   : > { %s266_s12 = ssub.s32 256, %s1120_s11 }
  0x54   : > { %267 = vsyncadd %s1123_s13, %s266_s12  ;;  %p614_p6 = scmp.ne.s32.totalorder %s1120_s11, 0  ;;  %s627_s7 = sshll.u32 %s1029_s6, 8 }
  0x55   : > { %s1131_s17 = scalar_lea.hbm %s1287_s1, %s627_s7  ;;  %s272_s14 = sshll.u32 %s256_s30, 4  ;;  %s1133_s14 = int_to_ptr.vmem [resolvable:$true] %s272_s14 }
  0x56   : > { %s768_s27 = scalar_lea.hbm %s1131_s17, %s1120_s11  ;;  %s772_s6 = scalar_lea.hbm %s1287_s1, 384 }
  0x57   : > { %p769_p2 = scmp.ne.s32.totalorder %s1131_s17, %s768_s27  ;;  %p773_p10 = scmp.lt.u32.totalorder %s1131_s17, %s1287_s1 }
  0x58   : > { %p774_p0 = scmp.lt.u32.totalorder %s772_s6, %s768_s27  ;;  %p776_p7 = scmp.lt.u32.totalorder %s768_s27, %s1131_s17 }
  0x59   : > { %p770_p3 = pnand %p769_p2, %p614_p6 }
  0x5a   : > { %p775_p4 = por %p774_p0, %p773_p10 }
  0x5b   : > { %p771_p5 = pneg %p770_p3 }
  0x5c   : > { %p777_p9 = por %p776_p7, %p775_p4 }
  0x5e   : > { %p778_p11 = pnand %p777_p9, %p771_p5 }
  0x60   : > { %781 = shalt.err (!%p778_p11)
}
  0x61   : > { %s782_s12 = scalar_lea.vmem %s1133_s14, %s1120_s11  ;;  %s943_s30 = smov [#allocation5]  }
  0x62   : > { %p783_p12 = scmp.ne.s32.totalorder %s1133_s14, %s782_s12  ;;  %s786_s7 = sshll.u32 %s943_s30, 4  ;;  %s787_s7 = int_to_ptr.vmem [resolvable:$false] %s786_s7 }
  0x63   : > { %s788_s10 = scalar_lea.vmem %s787_s7, 512  ;;  %p789_p2 = scmp.lt.s32.totalorder %s1133_s14, %s787_s7 }
  0x64   : > { %p784_p13 = pnand %p783_p12, %p614_p6  ;;  %p790_p3 = scmp.lt.s32.totalorder %s788_s10, %s782_s12 }
  0x66   : > { %p785_p1 = pneg %p784_p13  ;;  %p791_p10 = por %p790_p3, %p789_p2 }
  0x68   : > { %p792_p0 = pnand %p791_p10, %p785_p1 }
  0x6a   : > { %795 = shalt.err (!%p792_p0)
}
  0x6b   : > { %s944_s21 = smov 128   ;;  %s945_s27 = smov 8  }
  0x6c   : > { %278 = dma.hbm_to_vmem [thread:$0]  (%p614_p6), %s1131_s17, %s1120_s11, %s1133_s14, %s1123_s13, %s944_s21, %s944_s21, %s945_s27  }
  0x6d PF: > { %p618_p5 = scmp.ge.s32.totalorder %s938_s26, 1  ;;  %p280_p4 = scmp.lt.s32.totalorder %s938_s26, 3 }
  0x6f   : > { %p281_p7 = pnand %p618_p5, %p280_p4 }
  0x70   : > { %s286_s28 = sand.u32 (!%p281_p7), 1, %s922_s22  }
  0x71   : > { %284 = sbr.rel (%p281_p7) target bundleno = 393 (0x189), region = 36  ;;  %s619_s8 = sshll.u32 (!%p281_p7), %s286_s28, 4 }
  0x72   : > { %s287_s6 = scalar_lea.sflag (!%p281_p7), [#allocation3], %s286_s28  ;;  %s290_s25 = scalar_lea.vmem (!%p281_p7), [#allocation2], %s619_s8 }
  0x78   : > { %889 = dma.done.wait (%p1043_p8), %s287_s6, 256  }
  0x79   : > { %891 = vsyncadd (%p1043_p8), %s287_s6, 4294967040  ;;  %s296_s11 = scalar_lea.sflag [#allocation6], %s286_s28  ;;  %s299_s13 = scalar_lea.vmem [#allocation5], %s619_s8 }
  0x7a   : > { %893 = dma.done.wait (%p1043_p8), %s296_s11, 256  }
  0x7b   : > { %895 = vsyncadd (%p1043_p8), %s296_s11, 4294967040  ;;  %s1172_s17 = sshll.u32 %s930_s24, 4  ;;  %v395_v0 = vlaneseq  ;;  %v355_v6 = vld [vmem:[%s1288_s2] sm:$0x1]  ;;  %v390_v13 = vld [vmem:[%s290_s25 + $0x8] sm:$0xff]  ;;  %vm376_vm5 = vcmask 155648  }
  0x7c   : > { %v398_v1 = vstv %s1172_s17  ;;  %v356_v7 = vld [vmem:[%s1289_s3] sm:$0x1]  ;;  %v360_v10 = vadd.f32 1e-06, %v355_v6  ;;  %v369_v12 = vsub.f32 1.0, %v355_v6  ;;  %v392_v15 = vld [vmem:[%s299_s13 + $0x8] sm:$0xff]  ;;  %s1195_s28 = scalar_lea.hbm %s1291_s5, %s1172_s17 }
  0x7d   : > { %v396_v2 = vshrl.u32 %v395_v0, 7  ;;  %v389_v8 = vld [vmem:[%s290_s25] sm:$0xff]  ;;  %v357_v9 = vadd.f32 1e-06, %v356_v7  ;;  %v365_v11 = vsub.f32 1.0, %v356_v7  ;;  %v424_v27 = vand.u32 127, %v395_v0 }
  0x7e   : > { %v391_v14 = vld [vmem:[%s299_s13] sm:$0xff]  ;;  %v370_v18 = vadd.f32 1e-06, %v369_v12  ;;  %v946_v50 = vmov 0.05   ;;  %s1184_s24 = sand.u32 1, %s910_s19  }
  0x7f   : > { %v397_v3 = vadd.s32 8, %v396_v2  ;;  %v399_v4 = vadd.s32 %v398_v1, %v396_v2  ;;  %724 = vlog2.f32 %v357_v9  ;;  %v366_v17 = vadd.f32 1e-06, %v365_v11  ;;  %s1187_s9 = scalar_lea.vmem [#allocation7], %s1184_s24  ;;  %s333_s7 = scalar_lea.vmem [#allocation8], %s1184_s24 }
  0x80   : > { %726 = vlog2.f32 %v360_v10  ;;  %vm425_vm2 = vcmp.eq.s32.totalorder %v424_v27, 0  ;;  %vm426_vm3 = vcmp.eq.s32.totalorder %v424_v27, 127  ;;  %v947_v58 = vmov 0.0   ;;  %s475_s10 = sshll.u32 %s333_s7, 4  ;;  %s450_s6 = scalar_lea.sflag [#allocation9], %s1184_s24  ;;  %s1197_s10 = int_to_ptr.vmem [resolvable:$true] %s475_s10 }
  0x81   : > { %v400_v5 = vadd.s32 %v398_v1, %v397_v3  ;;  %vm401_vm0 = vcmp.lt.s32.totalorder %v399_v4, 20  ;;  %728 = vlog2.f32 %v366_v17  ;;  %vm427_vm4 = vmor %vm425_vm2, %vm426_vm3  ;;  %354 = vst [vmem:[%s1187_s9] sm:$0x1] %v947_v58  ;;  %s796_s25 = scalar_lea.vmem %s1197_s10, 16  ;;  %p1304_p6 = scmp.ne.s32.totalorder %s1302_s15, 0 }
  0x82   : > { %v405_v16 = vsel %vm401_vm0, %v389_v8, 1.0  ;;  %v403_v19 = vsel %vm401_vm0, %v391_v14, 0.0  ;;  %730 = vlog2.f32 %v370_v18  ;;  %v428_v51 = vsel %vm427_vm4, 0.025, %v946_v50  ;;  %p797_p8 = scmp.ne.s32.totalorder %s1197_s10, %s796_s25  ;;  %s948_s11 = smov [#allocation8]  }
  0x83   : > { %vm402_vm1 = vcmp.lt.s32.totalorder %v400_v5, 20  ;;  %v407_v22 = vadd.f32 1e-10, %v403_v19  ;;  %v413_v24 = vadd.f32 1e-10, %v405_v16  ;;  %s800_s13 = sshll.u32 %s948_s11, 4  ;;  %s801_s13 = int_to_ptr.vmem [resolvable:$false] %s800_s13 }
  0x84   : > { %v404_v20 = vsel %vm402_vm1, %v392_v15, 0.0  ;;  %v406_v21 = vsel %vm402_vm1, %v390_v13, 1.0  ;;  %p798_p9 = pnand %p797_p8, %p1304_p6  ;;  %s802_s14 = scalar_lea.vmem %s801_s13, 32 }
  0x85   : > { %v408_v23 = vadd.f32 1e-10, %v404_v20  ;;  %v414_v25 = vadd.f32 1e-10, %v406_v21  ;;  %732 = vlog2.f32 %v407_v22  ;;  %p803_p12 = scmp.lt.s32.totalorder %s1197_s10, %s801_s13  ;;  %p804_p13 = scmp.lt.s32.totalorder %s802_s14, %s796_s25 }
  0x86   : > { %p799_p11 = pneg %p798_p9 }
  0x87   : > { %734 = vlog2.f32 %v408_v23  ;;  %p805_p1 = por %p804_p13, %p803_p12 }
  0x88   : > { %736 = vlog2.f32 %v413_v24 }
  0x89   : > { %738 = vlog2.f32 %v414_v25  ;;  %v725_v26 = vpop.eup %724  ;;  %p806_p2 = pnand %p805_p1, %p799_p11 }
  0x8a   : > { %v727_v28 = vpop.eup %726  ;;  %v359_v29 = vmul.f32 0.6931472, %v725_v26 }
  0x8b   : > { %v729_v30 = vpop.eup %728  ;;  %v362_v31 = vmul.f32 0.6931472, %v727_v28 }
  0x8c   : > { %v731_v32 = vpop.eup %730  ;;  %v368_v33 = vmul.f32 0.6931472, %v729_v30 }
  0x8d   : > { %v363_v35 = vsub.f32 %v359_v29, %v362_v31  ;;  %v372_v36 = vmul.f32 0.6931472, %v731_v32 }
  0x8f   : > { %v733_v34 = vpop.eup %732  ;;  %v364_v40 = vmul.f32 %v363_v35, %v356_v7  ;;  %v373_v41 = vsub.f32 %v368_v33, %v372_v36 }
  0x90   : > { %v410_v38 = vmul.f32 0.6931472, %v733_v34 }
  0x91   : > { %v735_v37 = vpop.eup %734  ;;  %v374_v45 = vmul.f32 %v373_v41, %v365_v11 }
  0x92   : > { %v737_v39 = vpop.eup %736  ;;  %v412_v42 = vmul.f32 0.6931472, %v735_v37 }
  0x93   : > { %v739_v43 = vpop.eup %738  ;;  %v416_v44 = vmul.f32 0.6931472, %v737_v39  ;;  %v375_v48 = vadd.f32 %v374_v45, %v364_v40 }
  0x94   : > { %v418_v46 = vmul.f32 0.6931472, %v739_v43 }
  0x95   : > { %v419_v47 = vsub.f32 %v410_v38, %v416_v44  ;;  %v377_v53 = vsel %vm376_vm5, %v375_v48, 0.0 }
  0x96   : > { %v420_v49 = vsub.f32 %v412_v42, %v418_v46  ;;  %378 = vadd.xlane.f32.xlu0 %v377_v53 }
  0x97   : > { %v421_v52 = vmul.f32 %v419_v47, %v403_v19 }
  0x98   : > { %v422_v54 = vmul.f32 %v420_v49, %v404_v20 }
  0x99   : > { %v429_v55 = vmul.f32 %v428_v51, %v421_v52 }
  0x9a   : > { %v430_v56 = vmul.f32 %v428_v51, %v422_v54 }
  0x9c   : > { %v431_v57 = vadd.f32 %v430_v56, %v429_v55 }
  0x9e   : > { %432 = vadd.xlane.f32.xlu0 %v431_v57 }
 0x123   : > { %v379_v59 = vpop.xlane.xlu0 %378 }
 0x124   : > { %v380_v60 = vrot.slane %v379_v59, 4 }
 0x126   : > { %v381_v61 = vadd.f32 %v380_v60, %v379_v59 }
 0x128   : > { %v382_v62 = vrot.slane %v381_v61, 2 }
 0x12a   : > { %v383_v1 = vadd.f32 %v382_v62, %v381_v61 }
 0x12b   : > { %v433_v63 = vpop.xlane.xlu0 %432 }
 0x12c   : > { %v434_v0 = vrot.slane %v433_v63, 4  ;;  %v384_v3 = vrot.slane %v383_v1, 1 }
 0x12e   : > { %v435_v2 = vadd.f32 %v434_v0, %v433_v63  ;;  %v385_v5 = vadd.f32 %v384_v3, %v383_v1 }
 0x130   : > { %v436_v4 = vrot.slane %v435_v2, 2  ;;  %628 = vpush %v385_v5 }
 0x132   : > { %v437_v6 = vadd.f32 %v436_v4, %v435_v2 }
 0x134   : > { %v438_v7 = vrot.slane %v437_v6, 1 }
 0x136   : > { %v439_v8 = vadd.f32 %v438_v7, %v437_v6 }
 0x138   : > { %630 = vpush %v439_v8 }
 0x161   : > { %s629_s8 = spop %628 }
 0x162   : > { %v387_v9 = vstv %s629_s8 }
 0x163   : > { %388 = vst [vmem:[%s333_s7] sm:$0x1] %v387_v9 }
 0x164   : > { %809 = shalt.err (!%p806_p2)
}
 0x165   : > { %s810_s29 = scalar_lea.hbm %s1195_s28, 16  ;;  %s814_s7 = scalar_lea.hbm %s1291_s5, 32 }
 0x166   : > { %p811_p3 = scmp.ne.s32.totalorder %s1195_s28, %s810_s29  ;;  %p815_p5 = scmp.lt.u32.totalorder %s1195_s28, %s1291_s5 }
 0x167   : > { %p816_p4 = scmp.lt.u32.totalorder %s814_s7, %s810_s29  ;;  %p818_p8 = scmp.lt.u32.totalorder %s810_s29, %s1195_s28 }
 0x168   : > { %p812_p10 = pnand %p811_p3, %p1304_p6 }
 0x169   : > { %p817_p7 = por %p816_p4, %p815_p5 }
 0x16a   : > { %p813_p0 = pneg %p812_p10 }
 0x16b   : > { %p819_p9 = por %p818_p8, %p817_p7 }
 0x16d   : > { %p820_p11 = pnand %p819_p9, %p813_p0 }
 0x16f   : > { %823 = shalt.err (!%p820_p11)
}
 0x170   : > { %635 = dma.vmem_to_hbm [thread:$0]  (%p1304_p6), %s1197_s10, 16, %s1195_s28, %s450_s6   ;;  %v441_v10 = vld [vmem:[%s1187_s9] sm:$0x1] }
 0x171   : > { %s462_s8 = sshll.u32 %s1187_s9, 4  ;;  %s631_s25 = spop %630  ;;  %s1229_s8 = int_to_ptr.vmem [resolvable:$true] %s462_s8 }
 0x172   : > { %v442_v11 = vstv %s631_s25  ;;  %s1227_s14 = scalar_lea.hbm %s1290_s4, %s1172_s17  ;;  %s446_s29 = scalar_lea.sflag [#allocation4], %s1184_s24 }
 0x173   : > { %v443_v12 = vadd.f32 %v442_v11, %v441_v10  ;;  %s824_s12 = scalar_lea.vmem %s1229_s8, 16  ;;  %s949_s10 = smov [#allocation7]  }
 0x174   : > { %p825_p12 = scmp.ne.s32.totalorder %s1229_s8, %s824_s12  ;;  %s828_s28 = sshll.u32 %s949_s10, 4  ;;  %s829_s28 = int_to_ptr.vmem [resolvable:$false] %s828_s28 }
 0x175   : > { %444 = vst [vmem:[%s1187_s9] sm:$0x1] %v443_v12  ;;  %s830_s6 = scalar_lea.vmem %s829_s28, 32  ;;  %p831_p2 = scmp.lt.s32.totalorder %s1229_s8, %s829_s28 }
 0x176   : > { %p826_p13 = pnand %p825_p12, %p1304_p6  ;;  %p832_p3 = scmp.lt.s32.totalorder %s830_s6, %s824_s12 }
 0x178   : > { %p827_p1 = pneg %p826_p13  ;;  %p833_p10 = por %p832_p3, %p831_p2 }
 0x17a   : > { %p834_p0 = pnand %p833_p10, %p827_p1 }
 0x17c   : > { %837 = shalt.err (!%p834_p0)
}
 0x17d   : > { %s838_s17 = scalar_lea.hbm %s1227_s14, 16  ;;  %s842_s30 = scalar_lea.hbm %s1290_s4, 32 }
 0x17e   : > { %p839_p5 = scmp.ne.s32.totalorder %s1227_s14, %s838_s17  ;;  %p843_p8 = scmp.lt.u32.totalorder %s1227_s14, %s1290_s4 }
 0x17f   : > { %p844_p9 = scmp.lt.u32.totalorder %s842_s30, %s838_s17  ;;  %p846_p12 = scmp.lt.u32.totalorder %s838_s17, %s1227_s14 }
 0x180   : > { %p840_p4 = pnand %p839_p5, %p1304_p6 }
 0x181   : > { %p845_p11 = por %p844_p9, %p843_p8 }
 0x182   : > { %p841_p7 = pneg %p840_p4 }
 0x183   : > { %p847_p13 = por %p846_p12, %p845_p11 }
 0x185   : > { %p848_p1 = pnand %p847_p13, %p841_p7 }
 0x187   : > { %851 = shalt.err (!%p848_p1)
}
 0x188   : > { %634 = dma.vmem_to_hbm [thread:$0]  (%p1304_p6), %s1229_s8, 16, %s1227_s14, %s446_s29  }
 0x189 PF: > { %s487_s27 = sand.u32 1, %s906_s18   ;;  %p1305_p2 = scmp.ne.s32.totalorder %s1303_s16, 0 }
 0x18a   : > { %p1306_p3 = scmp.ge.s32.totalorder %s938_s26, 2  ;;  %s488_s25 = scalar_lea.sflag [#allocation4], %s487_s27 }
 0x18c   : > { %p639_p10 = pnand %p1306_p3, %p1305_p2 }
 0x18e   : > { %897 = dma.done.wait (!%p639_p10), %s488_s25, 16  }
 0x18f   : > { %899 = vsyncadd (!%p639_p10), %s488_s25, 4294967280  ;;  %s496_s11 = scalar_lea.sflag [#allocation9], %s487_s27 }
 0x190   : > { %901 = dma.done.wait (!%p639_p10), %s496_s11, 16  }
 0x191   : > { %903 = vsyncadd (!%p639_p10), %s496_s11, 4294967280  ;;  %s28_s26 = sadd.s32 1, %s938_s26   ;;  %s1307_s15 = sld [smem:[#allocation16_spill]] }
 0x192   : > { %p25_p0 = scmp.ge.s32.totalorder %s28_s26, 4   ;;  %s1308_s8 = sld [smem:[#allocation17_spill]] }
 0x193   : > { %s1309_s24 = sld [smem:[#allocation14_spill]]  ;;  %s1310_s25 = sld [smem:[#allocation15_spill]] }
 0x194   : > { %s1311_s18 = smov %s910_s19  ;;  %s1312_s19 = smov %s914_s20 }
 0x195   : > { %s1314_s21 = smov %s922_s22  ;;  %s1315_s22 = smov %s926_s23 }
 0x196   :  { %27 = sbr.rel (!%p25_p0) target bundleno = 12 (0xc), region = 115 }
 0x197   : > { %s1313_s20 = smov %s1307_s15 }
 0x198   : > { %s1316_s23 = smov %s1308_s8 }
 0x19d   :  { %500 = vsyncpa [#allocation3], 1 }
 0x19e   :  { %502 = vsyncpa [#allocation3 + $0x1], 1 }
 0x19f   :  { %503 = vsyncpa [#allocation6], 1 }
 0x1a0   :  { %505 = vsyncpa [#allocation6 + $0x1], 1 }
 0x1a1   :  { %506 = vsyncpa [#allocation4], 1 }
 0x1a2   :  { %508 = vsyncpa [#allocation4 + $0x1], 1 }
 0x1a3   :  { %509 = vsyncpa [#allocation9], 1 }
 0x1a4   :  { %511 = vsyncpa [#allocation9 + $0x1], 1 }

</bundles_post_ra>
